<compile_context>
chip_gen: v5e
topology: v5e:2x2
jax: 0.10.0
libtpu: 0.0.40
codegen_flags: <defaults>
</compile_context>

<pallas_src>
import functools

import numpy as np
import jax
import jax.numpy as jnp
from jax.experimental import pallas as pl
from jax.experimental.pallas import tpu as pltpu


# ----------------------------------------------------------------- kernels --
def _pad_rows_kernel(x_ref, o_ref, *, fill, h, w):
    """'hw' path, row-tiled: copy valid image rows, fill bottom/right padding only."""
    bb, tr, out_w = o_ref.shape
    fill_val = jnp.asarray(fill, dtype=o_ref.dtype)
    row0 = pl.program_id(1) * tr  # first padded-output row of this tile

    @pl.when(row0 + tr <= h)  # tile fully inside the image: pure copy
    def _():
        o_ref[:, :, :w] = x_ref[...]

    @pl.when(row0 + tr > h)  # tile crosses / lies past the bottom edge: mask invalid rows
    def _():
        rows = jax.lax.broadcasted_iota(jnp.int32, (1, tr, 1), 1) + row0
        o_ref[:, :, :w] = jnp.where(rows < h, x_ref[...], fill_val)

    if out_w > w:  # right padding strip (static)
        o_ref[:, :, w:] = jnp.full((bb, tr, out_w - w), fill_val, dtype=o_ref.dtype)


def _pad_plane_kernel(x_ref, o_ref, *, fill, top, left, h, w):
    """Whole-(padded-)plane block: interior copy + only the pad strips (no full fill)."""
    bb, out_h, out_w = o_ref.shape
    fill_val = jnp.asarray(fill, dtype=o_ref.dtype)
    if top > 0:
        o_ref[:, :top, :] = jnp.full((bb, top, out_w), fill_val, dtype=o_ref.dtype)
    if top + h < out_h:
        o_ref[:, top + h:, :] = jnp.full((bb, out_h - top - h, out_w), fill_val,
                                         dtype=o_ref.dtype)
    if left > 0:
        o_ref[:, top:top + h, :left] = jnp.full((bb, h, left), fill_val, dtype=o_ref.dtype)
    if left + w < out_w:
        o_ref[:, top:top + h, left + w:] = jnp.full((bb, h, out_w - left - w), fill_val,
                                                    dtype=o_ref.dtype)
    # TODO(synk): when left % 128 != 0 ('equal_side'), this interior store is lane-misaligned;
    # could round `left` to a lane boundary + masked residual strip if it ever matters.
    o_ref[:, top:top + h, left:left + w] = x_ref[...]


# ------------------------------------------------------------ tile picking --
_BLOCK_BUDGET = 8 << 20      # per-step in+out block bytes (runtime double-buffers this)
_TARGET_STEPS = 4            # >=4 grid steps: DMA/compute overlap + both v7x TensorCores
_MIN_BLOCK = 512 << 10       # don't shrink blocks below this just to add grid steps


def _padded_bytes(rows, cols, itemsize):
    """Approximate VMEM bytes of a (rows, cols) tile incl. vreg lane/sublane padding."""
    itemsize = int(itemsize)
    sub = 8 * max(1, 4 // max(itemsize, 1))       # f32 -> 8, bf16 -> 16, int8 -> 32
    r = -(-rows // sub) * sub
    c = -(-cols // 128) * 128
    return r * c * itemsize


def _divisors(n):
    return [d for d in range(1, n + 1) if n % d == 0]


def _choose_tiling(batch, h, w, out_h, out_w, itemsize, can_tile_rows):
    """Pick (batch_block, row_tile or None) balancing VMEM footprint vs grid length."""
    trs = [None]  # None -> whole-plane kernel
    if can_tile_rows:
        trs += [d for d in _divisors(out_h) if d % 8 == 0 and d < out_h]

    def block_bytes(bb, tr):
        if tr is None:
            return bb * (_padded_bytes(h, w, itemsize) + _padded_bytes(out_h, out_w, itemsize))
        return bb * (_padded_bytes(tr, w, itemsize) + _padded_bytes(tr, out_w, itemsize))

    best_key, best = None, (batch, None)
    for bb in _divisors(batch):
        for tr in trs:
            nr = 1 if tr is None else out_h // tr
            steps = (batch // bb) * nr
            blk = block_bytes(bb, tr)
            fits = blk <= _BLOCK_BUDGET
            key = (
                1 if fits else 0,                  # must fit the VMEM budget
                min(steps, _TARGET_STEPS),         # enough steps for pipelining / megacore
                1 if blk >= _MIN_BLOCK else 0,     # stay out of the per-step-overhead regime
                blk if fits else -blk,             # then the biggest fitting block
            )
            if best_key is None or key > best_key:
                best_key, best = key, (bb, tr)
    return best


def _vmem_limit(block_bytes):
    # in+out blocks are each double-buffered by the pipeline; add headroom.
    return int(min(max(2.5 * block_bytes + (1 << 20), 8 << 20), 32 << 20))


# ----------------------------------------------------------------- wrapper --
def _constant_pad(x, out_h, out_w, top, left, fill):
    orig_shape = x.shape
    h, w = orig_shape[-2:]
    lead = orig_shape[:-2]
    batch = int(np.prod(lead)) if lead else 1
    x3 = x.reshape(batch, h, w)
    itemsize = jnp.dtype(x.dtype).itemsize

    can_tile_rows = (top == 0) and (left == 0)   # 'hw' / 'right_bottom' path
    bb, tr = _choose_tiling(batch, h, w, out_h, out_w, itemsize, can_tile_rows)

    cost = pl.CostEstimate(flops=0, transcendentals=0,
                           bytes_accessed=int(batch * (h * w + out_h * out_w) * itemsize))
    out_shape = jax.ShapeDtypeStruct((batch, out_h, out_w), x.dtype)

    if tr is None:
        # Whole padded plane per grid step (also covers 'equal_side').
        blk = bb * (_padded_bytes(h, w, itemsize) + _padded_bytes(out_h, out_w, itemsize))
        kernel = functools.partial(_pad_plane_kernel, fill=fill, top=top, left=left, h=h, w=w)
        out = pl.pallas_call(
            kernel,
            out_shape=out_shape,
            grid=(batch // bb,),
            in_specs=[pl.BlockSpec((bb, h, w), lambda i: (i, 0, 0))],
            out_specs=pl.BlockSpec((bb, out_h, out_w), lambda i: (i, 0, 0)),
            compiler_params=pltpu.CompilerParams(
                dimension_semantics=("parallel",),
                vmem_limit_bytes=_vmem_limit(blk)),
            cost_estimate=cost,
        )(x3)
    else:
        # Row-tiled over the padded height; grid (batch blocks, row tiles), both parallel.
        nr = out_h // tr
        blk = bb * (_padded_bytes(tr, w, itemsize) + _padded_bytes(tr, out_w, itemsize))
        jin_max = (h - 1) // tr  # last input row-block with any valid rows
        kernel = functools.partial(_pad_rows_kernel, fill=fill, h=h, w=w)
        out = pl.pallas_call(
            kernel,
            out_shape=out_shape,
            grid=(batch // bb, nr),
            in_specs=[pl.BlockSpec(
                (bb, tr, w),
                lambda i, j: (i, jnp.minimum(j, jin_max), 0))],
            out_specs=pl.BlockSpec((bb, tr, out_w), lambda i, j: (i, j, 0)),
            compiler_params=pltpu.CompilerParams(
                dimension_semantics=("parallel", "parallel"),
                vmem_limit_bytes=_vmem_limit(blk)),
            cost_estimate=cost,
        )(x3)

    return out.reshape(*lead, out_h, out_w)


class AdaptivePad:
    """JAX/Pallas port of sc2bench.transforms.misc.AdaptivePad (tensor path)."""

    def __init__(self, fill=0, padding_position='hw', padding_mode='constant',
                 factor=128, returns_org_patch_size=False):
        if padding_mode != 'constant':
            # TODO(synk): 'edge'/'reflect'/'symmetric' padding modes not implemented.
            raise NotImplementedError("only padding_mode='constant' is supported")
        self.fill = fill
        self.padding_position = padding_position
        self.padding_mode = padding_mode
        self.factor = factor
        self.returns_org_patch_size = returns_org_patch_size

    def __call__(self, x):
        height, width = x.shape[-2:]
        factor = self.factor
        vertical_pad_size = 0 if height % factor == 0 else int((height // factor + 1) * factor - height)
        horizontal_pad_size = 0 if width % factor == 0 else int((width // factor + 1) * factor - width)
        padded_vertical_size = vertical_pad_size + height
        padded_horizontal_size = horizontal_pad_size + width
        assert padded_vertical_size % factor == 0 and padded_horizontal_size % factor == 0, \
            'padded vertical and horizontal sizes ({}, {}) should be factor of {}'.format(
                padded_vertical_size, padded_horizontal_size, factor)

        if self.padding_position == 'equal_side':
            # torchvision pad([ph, pv]) -> left/right += ph, top/bottom += pv
            top, left = vertical_pad_size // 2, horizontal_pad_size // 2
            out_h = height + 2 * (vertical_pad_size // 2)
            out_w = width + 2 * (horizontal_pad_size // 2)
        else:  # 'hw' (default) / 'right_bottom': pad([0, 0, ph, pv]) -> right/bottom only
            top, left = 0, 0
            out_h, out_w = padded_vertical_size, padded_horizontal_size

        if out_h == height and out_w == width:
            padded = x  # nothing to pad; passthrough (JAX arrays are immutable)
        else:
            padded = _constant_pad(x, out_h, out_w, top, left, self.fill)

        if self.returns_org_patch_size:
            return padded, (height, width)
        return padded


# -------------------------------------------------------------------- main --
if __name__ == "__main__":
    key = jax.random.PRNGKey(0)
    x = jax.random.normal(key, (2, 4, 100, 200), dtype=jnp.float32)
    x_np = np.asarray(x)

    # default: fill=0, padding_position='hw' -> pad right/bottom to multiples of 128
    y = AdaptivePad()(x)
    jax.block_until_ready(y)
    assert y.shape == (2, 4, 128, 256) and y.dtype == x.dtype
    ref = np.pad(x_np, ((0, 0), (0, 0), (0, 28), (0, 56)),
                 mode='constant', constant_values=0.0)
    assert np.array_equal(np.asarray(y), ref)

    # returns_org_patch_size path
    y2, (oh, ow) = AdaptivePad(returns_org_patch_size=True)(x)
    jax.block_until_ready(y2)
    assert (oh, ow) == (100, 200) and np.array_equal(np.asarray(y2), ref)

    # 'equal_side' path with a non-zero fill (whole-plane kernel)
    y3 = AdaptivePad(fill=1.0, padding_position='equal_side')(x)
    jax.block_until_ready(y3)
    ref3 = np.pad(x_np, ((0, 0), (0, 0), (14, 14), (28, 28)),
                  mode='constant', constant_values=1.0)
    assert y3.shape == (2, 4, 128, 256) and np.array_equal(np.asarray(y3), ref3)

    # already-aligned input -> passthrough (no kernel launch)
    x_aligned = jax.random.normal(jax.random.PRNGKey(1), (1, 3, 128, 128), dtype=jnp.float32)
    y4 = AdaptivePad()(x_aligned)
    assert y4.shape == x_aligned.shape and np.array_equal(np.asarray(y4), np.asarray(x_aligned))

    print("KERNEL_OK")
</pallas_src>

<mosaic_0001>
module attributes {stable_mosaic.version = 11 : i64} {
  func.func @_pad_rows_kernel(%arg0: i32, %arg1: i32, %arg2: memref<4x64x200xf32, #tpu.memory_space<vmem>>, %arg3: memref<4x64x256xf32, #tpu.memory_space<vmem>>) attributes {dimension_semantics = [#tpu.dimension_semantics<parallel>, #tpu.dimension_semantics<parallel>], iteration_bounds = array<i64: 2, 2>, scalar_prefetch = 0 : i64, scratch_operands = 0 : i64, tpu.core_type = #tpu.core_type<tc>, window_params = [{transform_indices = @transform_0, window_bounds = array<i64: 4, 64, 200>}, {transform_indices = @transform_1, window_bounds = array<i64: 4, 64, 256>}]} {
    %c64_i32 = arith.constant 64 : i32
    %0 = arith.muli %arg1, %c64_i32 : i32
    %c64_i32_0 = arith.constant 64 : i32
    %1 = arith.addi %0, %c64_i32_0 : i32
    %c100_i32 = arith.constant 100 : i32
    %2 = arith.cmpi sle, %1, %c100_i32 : i32
    %3 = arith.extui %2 : i1 to i32
    %c0_i32 = arith.constant 0 : i32
    %4 = arith.cmpi ne, %3, %c0_i32 : i32
    scf.if %4 {
      %c0_6 = arith.constant 0 : index
      %c0_7 = arith.constant 0 : index
      %c0_8 = arith.constant 0 : index
      %11 = vector.load %arg2[%c0_6, %c0_7, %c0_8] : memref<4x64x200xf32, #tpu.memory_space<vmem>>, vector<4x64x200xf32>
      %c0_9 = arith.constant 0 : index
      %c0_10 = arith.constant 0 : index
      %c0_11 = arith.constant 0 : index
      %12 = vector.load %arg3[%c0_9, %c0_10, %c0_11] : memref<4x64x256xf32, #tpu.memory_space<vmem>>, vector<4x64x200xf32>
      tpu.vector_store %arg3[%c0_9, %c0_10, %c0_11], %11 {strides = array<i32>} : memref<4x64x256xf32, #tpu.memory_space<vmem>>, vector<4x64x200xf32>,
    } else {
    }
    %c64_i32_1 = arith.constant 64 : i32
    %5 = arith.addi %0, %c64_i32_1 : i32
    %c100_i32_2 = arith.constant 100 : i32
    %6 = arith.cmpi sgt, %5, %c100_i32_2 : i32
    %7 = arith.extui %6 : i1 to i32
    %cst = arith.constant 0.000000e+00 : f32
    %c0_i32_3 = arith.constant 0 : i32
    %8 = arith.cmpi ne, %7, %c0_i32_3 : i32
    scf.if %8 {
      %11 = tpu.iota {dimensions = array<i32: 1>} : vector<1x64x1xi32>
      %12 = vector.broadcast %0 : i32 to vector<1x64x1xi32>
      %13 = arith.addi %11, %12 : vector<1x64x1xi32>
      %c100_i32_6 = arith.constant 100 : i32
      %14 = vector.broadcast %c100_i32_6 : i32 to vector<1x64x1xi32>
      %15 = arith.cmpi slt, %13, %14 : vector<1x64x1xi32>
      %c0_7 = arith.constant 0 : index
      %c0_8 = arith.constant 0 : index
      %c0_9 = arith.constant 0 : index
      %16 = vector.load %arg2[%c0_7, %c0_8, %c0_9] : memref<4x64x200xf32, #tpu.memory_space<vmem>>, vector<4x64x200xf32>
      %17 = vector.shape_cast %15 : vector<1x64x1xi1> to vector<1x64x1xi1>
      %18 = vector.broadcast %17 : vector<1x64x1xi1> to vector<4x64x200xi1>
      %19 = vector.broadcast %cst : f32 to vector<4x64x200xf32>
      %20 = arith.select %18, %16, %19 : vector<4x64x200xi1>, vector<4x64x200xf32>
      %c0_10 = arith.constant 0 : index
      %c0_11 = arith.constant 0 : index
      %c0_12 = arith.constant 0 : index
      %21 = vector.load %arg3[%c0_10, %c0_11, %c0_12] : memref<4x64x256xf32, #tpu.memory_space<vmem>>, vector<4x64x200xf32>
      tpu.vector_store %arg3[%c0_10, %c0_11, %c0_12], %20 {strides = array<i32>} : memref<4x64x256xf32, #tpu.memory_space<vmem>>, vector<4x64x200xf32>,
    } else {
    }
    %cst_4 = arith.constant 0.000000e+00 : f32
    %9 = vector.broadcast %cst_4 : f32 to vector<4x64x56xf32>
    %c0 = arith.constant 0 : index
    %c0_5 = arith.constant 0 : index
    %c200 = arith.constant 200 : index
    %10 = vector.load %arg3[%c0, %c0_5, %c200] : memref<4x64x256xf32, #tpu.memory_space<vmem>>, vector<4x64x56xf32>
    tpu.vector_store %arg3[%c0, %c0_5, %c200], %9 {strides = array<i32>} : memref<4x64x256xf32, #tpu.memory_space<vmem>>, vector<4x64x56xf32>,
    return
  }
  func.func @transform_0(%arg0: i32, %arg1: i32) -> (i32, i32, i32) {
    %c1_i32 = arith.constant 1 : i32
    %0 = arith.minsi %arg1, %c1_i32 : i32
    %c0_i32 = arith.constant 0 : i32
    %c0_i32_0 = arith.constant 0 : i32
    return %arg0, %0, %c0_i32 : i32, i32, i32
  }
  func.func @transform_1(%arg0: i32, %arg1: i32) -> (i32, i32, i32) {
    %c0_i32 = arith.constant 0 : i32
    %c0_i32_0 = arith.constant 0 : i32
    return %arg0, %arg1, %c0_i32 : i32, i32, i32
  }
}

</mosaic_0001>

<bundles_post_ra>
// kernel: tpu_custom_call.1
= control target key start
LH: loop header
LB: loop body
LE: loop exit
PB: predicated region body
PF: predicated region fallthrough
CT: control target
= control target key end

     0   :  { %s2110_s0 = inlined_call_operand.vmem [shape: f32[8,100,200], index: 0, kind: input, shape index: {}]   ;;  %s2111_s1 = inlined_call_operand.hbm [shape: f32[8,128,256], index: 1, kind: output, shape index: {}]  }
   0x1   :  { %2113 = sst [smem:[#allocation9_spill]] %s2110_s0 }
   0x2   :  { %6 = vsyncpa [#allocation4], 0 }
   0x3   :  { %8 = vsyncpa [#allocation4 + $0x1], 0  ;;  %s1236_s6 = smov 0   ;;  %s1238_s7 = smov 0  }
   0x4   :  { %s1240_s8 = smov 0   ;;  %s1242_s9 = smov 0  }
   0x5   :  { %s1244_s10 = smov 0   ;;  %s1246_s11 = smov 0  }
   0x6   :  { %s1248_s12 = smov 0   ;;  %s1250_s13 = smov 0  }
   0x7   :  { %s1252_s14 = smov 0   ;;  %s1254_s15 = smov 0  }
   0x8 LB: > { %s860_s16 = sadd.s32 4294967295, %s1184_s15   ;;  %s861_s17 = sadd.s32 4294967294, %s1184_s15   ;;  %s1184_s15 = sphi %s1254_s15, %s14_s15   ;;  %s1180_s14 = sphi %s1252_s14, %s2137_s14   ;;  %s1176_s13 = sphi %s1250_s13, %s2136_s13   ;;  %s1172_s12 = sphi %s1248_s12, %s2135_s12   ;;  %s1168_s11 = sphi %s1246_s11, %s2134_s11   ;;  %s1164_s10 = sphi %s1244_s10, %s2133_s10   ;;  %s1160_s9 = sphi %s1242_s9, %s2132_s9   ;;  %s1156_s8 = sphi %s1240_s8, %s2131_s8   ;;  %s1152_s7 = sphi %s1238_s7, %s2130_s7   ;;  %s1148_s6 = sphi %s1236_s6, %s2129_s6  }
   0x9   : > { %s23_s18 = sadd.s32 1, %s1176_s13  ;;  %s26_s19 = sadd.s32 1, %s1180_s14 }
   0xa   : > { %p24_p0 = scmp.ge.s32.totalorder %s23_s18, 2  ;;  %p30_p1 = scmp.lt.s32.totalorder %s1176_s13, 1 }
   0xb   : > { %s39_s20 = sadd.s32 1, %s1164_s10  ;;  %p46_p2 = scmp.ne.s32.totalorder %s1164_s10, %s1160_s9 }
   0xc   : > { %s2139_s18 = smov (%p24_p0, %s23_s18), 0  ;;  %s2141_s19 = smov (!%p24_p0, %s26_s19), %s1180_s14 }
   0xd   : > { %s1298_s21 = scalar_select %p30_p1, %s1176_s13, 1 }
   0xe   : > { %p28_p3 = scmp.ge.s32.totalorder %s2141_s19, 2  ;;  %p32_p4 = scmp.lt.s32.totalorder %s2139_s18, 1 }
   0xf   : > { %p47_p5 = scmp.eq.s32.totalorder %s1184_s15, 0  ;;  %s63_s22 = ssub.s32 %s1176_s13, %s2139_s18 }
  0x10   : > { %s2143_s19 = smov (%p28_p3, %s2141_s19), 0  ;;  %s67_s29 = sadd.s32 1, %s1156_s8 }
  0x11   : > { %2114 = sst [smem:[#allocation8_spill]] %s2143_s19  ;;  %s34_s24 = ssub.s32 %s1180_s14, %s2143_s19 }
  0x12   : > { %s33_s23 = scalar_select %p32_p4, %s2139_s18, 1 }
  0x13   : > { %p1309_p6 = por %p47_p5, %p46_p2  ;;  %s64_s27 = sor.u32 %s63_s22, %s34_s24 }
  0x14   : > { %s35_s26 = ssub.s32 %s1298_s21, %s33_s23  ;;  %p65_p7 = scmp.eq.s32.totalorder %s64_s27, 0 }
  0x15   : > { %s36_s28 = sor.u32 %s35_s26, %s34_s24  ;;  %p77_p9 = scmp.ne.s32.totalorder %s1156_s8, %s1152_s7 }
  0x16   : > { %p37_p8 = scmp.eq.s32.totalorder %s36_s28, 0  ;;  %p78_p10 = scmp.eq.s32.totalorder %s860_s16, 3 }
  0x17   : > { %s1316_s30 = scalar_select %p65_p7, %s1156_s8, %s67_s29  }
  0x18   : > { %s1319_s2 = scalar_select %p37_p8, %s1164_s10, %s39_s20  }
  0x19   : > { %p83_p11 = scmp.ne.s32.totalorder %s1152_s7, %s1148_s6  ;;  %p84_p12 = scmp.eq.s32.totalorder %s861_s17, 3 }
  0x1a   : > { %p1327_p13 = por %p78_p10, %p77_p9  ;;  %p863_p1 = scmp.ge.s32.totalorder %s1184_s15, 4 }
  0x1b   : > { %p1331_p0 = por %p84_p12, %p83_p11 }
  0x1c   : > { %100 = sbr.rel (%p863_p1) target bundleno = 96 (0x60), region = 16 }
  0x21   : > { %103 = sbr.rel (!%p1309_p6) target bundleno = 96 (0x60), region = 20  ;;  %s105_s5 = sand.u32 (%p1309_p6), 1, %s1164_s10  }
  0x22   : > { %s866_s16 = sshll.u32 (%p1309_p6), %s1298_s21, 3  ;;  %s864_s17 = sshll.u32 (%p1309_p6), %s105_s5, 9 }
  0x23   : > { %s112_s20 = ssub.s32 (%p1309_p6), 13, %s866_s16  ;;  %s898_s22 = sshll.u32 (%p1309_p6), %s1298_s21, 4 }
  0x24   : > { %p113_p2 = scmp.lt.s32.totalorder (%p1309_p6), %s112_s20, 8  ;;  %s903_s23 = smul.u32 (%p1309_p6), 104, %s1180_s14 }
  0x25   : > { %s2118_s0 = sld [smem:[#allocation9_spill]] (%p1309_p6)  ;;  %s1350_s19 = scalar_lea.vmem (%p1309_p6), [#allocation2], %s864_s17  }
  0x26   : > { %s2145_s20 = smov (!%p113_p2, %s112_s20), 8  ;;  %s120_s24 = sadd.s32 %s903_s23, %s898_s22 }
  0x27   : > { %s897_s26 = sshll.u32 %s2145_s20, 6  ;;  %s872_s27 = sshll.u32 %s120_s24, 3 }
  0x28   : > { %p873_p3 = scmp.eq.s32.totalorder %s897_s26, 0 }
  0x29   : > { %s1353_s5 = sshrl.u32 (!%p873_p3), %s2145_s20, 2  ;;  %s2119_s21 = smov (!%p873_p3), %s1350_s19 }
  0x2a   : > { %125 = sbr.rel (%p873_p3) target bundleno = 96 (0x60), region = 24  ;;  %s1361_s22 = smov (!%p873_p3), 0  }
  0x2b   : > { %s1348_s29 = scalar_lea.vmem %s2118_s0, %s872_s27   ;;  %s1363_s23 = smov (!%p873_p3), 0  }
  0x2c   : > { %s2120_s16 = smov (!%p873_p3), %s1348_s29 }
  0x2f LB: >> { %v138_v0 = vld [vmem:[%s1192_s16] sm:$0xff]  ;;  %v140_v1 = vld [vmem:[%s1192_s16 + $0x10] sm:$0xff]  ;;  %s202_s17 = sadd.s32 1, %s1196_s22  ;;  %v146_v4 = vld [vmem:[%s1192_s16 + $0x8] sm:$0xff]  ;;  %s132_s23 = sadd.s32 1, %s1200_s23   ;;  %s1200_s23 = sphi %s1363_s23, %s132_s23   ;;  %s1196_s22 = sphi %s1361_s22, %s2123_s22   ;;  %s1192_s16 = sphi %s2120_s16, %s2122_s16   ;;  %s1188_s21 = sphi %s2119_s21, %s2121_s21  }
  0x30   : >> { %v142_v2 = vld [vmem:[%s1192_s16 + $0x20] sm:$0xff]  ;;  %139 = vst [vmem:[%s1188_s21] sm:$0xff] %v138_v0  ;;  %v144_v3 = vld [vmem:[%s1192_s16 + $0x30] sm:$0xff]  ;;  %p203_p4 = scmp.ge.s32.totalorder %s202_s17, %s1353_s5  ;;  %v148_v5 = vld [vmem:[%s1192_s16 + $0x18] sm:$0xff]  ;;  %p131_p5 = scmp.ge.s32.totalorder %s132_s23, %s1353_s5 }
  0x31   : >> { %141 = vst [vmem:[%s1188_s21 + $0x10] sm:$0xff] %v140_v1  ;;  %v150_v6 = vld [vmem:[%s1192_s16 + $0x28] sm:$0xff]  ;;  %v152_v7 = vld [vmem:[%s1192_s16 + $0x38] sm:$0xff]  ;;  %v154_v8 = vld [vmem:[%s1192_s16 + $0xd0] sm:$0xff]  ;;  %s1463_s28 = sand.u32 (%p131_p5), 3, %s2145_s20   ;;  %s899_s25 = sshll.u32 (%p131_p5), %s1353_s5, 6 }
  0x32   : >> { %143 = vst [vmem:[%s1188_s21 + $0x20] sm:$0xff] %v142_v2  ;;  %s2147_s17 = smov (%p203_p4, %s202_s17), 0  ;;  %v156_v9 = vld [vmem:[%s1192_s16 + $0xe0] sm:$0xff]  ;;  %v158_v10 = vld [vmem:[%s1192_s16 + $0xf0] sm:$0xff]  ;;  %v162_v12 = vld [vmem:[%s1192_s16 + $0xd8] sm:$0xff]  ;;  %s1470_s0 = scalar_lea.vmem (%p131_p5), %s1350_s19, %s899_s25 [#allocation2]  }
  0x33   : >> { %145 = vst [vmem:[%s1188_s21 + $0x30] sm:$0xff] %v144_v3  ;;  %s875_s24 = sshll.u32 %s2147_s17, 6  ;;  %v160_v11 = vld [vmem:[%s1192_s16 + $0x100] sm:$0xff]  ;;  %v164_v13 = vld [vmem:[%s1192_s16 + $0xe8] sm:$0xff]  ;;  %v166_v14 = vld [vmem:[%s1192_s16 + $0xf8] sm:$0xff]  ;;  %s2123_s22 = smov %s2147_s17 }
  0x34   : >> { %147 = vst [vmem:[%s1188_s21 + $0x8] sm:$0xff] %v146_v4  ;;  %s1395_s26 = scalar_lea.vmem %s1348_s29, %s875_s24   ;;  %s1398_s27 = scalar_lea.vmem %s1350_s19, %s875_s24 [#allocation2]   ;;  %v168_v15 = vld [vmem:[%s1192_s16 + $0x108] sm:$0xff]  ;;  %v170_v16 = vld [vmem:[%s1192_s16 + $0x1a0] sm:$0xff]  ;;  %v172_v17 = vld [vmem:[%s1192_s16 + $0x1b0] sm:$0xff] }
  0x35   : >> { %149 = vst [vmem:[%s1188_s21 + $0x18] sm:$0xff] %v148_v5  ;;  %v174_v18 = vld [vmem:[%s1192_s16 + $0x1c0] sm:$0xff]  ;;  %v176_v19 = vld [vmem:[%s1192_s16 + $0x1d0] sm:$0xff]  ;;  %v178_v20 = vld [vmem:[%s1192_s16 + $0x1a8] sm:$0xff]  ;;  %s1467_s24 = scalar_lea.vmem (%p131_p5), %s1348_s29, %s899_s25   ;;  %p880_p6 = scmp.le.s32.totalorder (%p131_p5), %s1463_s28, 0 }
  0x36   : >> { %151 = vst [vmem:[%s1188_s21 + $0x28] sm:$0xff] %v150_v6  ;;  %v180_v21 = vld [vmem:[%s1192_s16 + $0x1b8] sm:$0xff]  ;;  %v182_v22 = vld [vmem:[%s1192_s16 + $0x1c8] sm:$0xff]  ;;  %v186_v24 = vld [vmem:[%s1192_s16 + $0x270] sm:$0xff] }
  0x37   : >> { %153 = vst [vmem:[%s1188_s21 + $0x38] sm:$0xff] %v152_v7  ;;  %v184_v23 = vld [vmem:[%s1192_s16 + $0x1d8] sm:$0xff]  ;;  %v188_v25 = vld [vmem:[%s1192_s16 + $0x280] sm:$0xff]  ;;  %v190_v26 = vld [vmem:[%s1192_s16 + $0x290] sm:$0xff] }
  0x38   : >> { %155 = vst [vmem:[%s1188_s21 + $0x80] sm:$0xff] %v154_v8  ;;  %v192_v27 = vld [vmem:[%s1192_s16 + $0x2a0] sm:$0xff]  ;;  %v194_v28 = vld [vmem:[%s1192_s16 + $0x278] sm:$0xff]  ;;  %v196_v29 = vld [vmem:[%s1192_s16 + $0x288] sm:$0xff] }
  0x39   : >> { %157 = vst [vmem:[%s1188_s21 + $0x90] sm:$0xff] %v156_v9  ;;  %v198_v30 = vld [vmem:[%s1192_s16 + $0x298] sm:$0xff]  ;;  %v200_v31 = vld [vmem:[%s1192_s16 + $0x2a8] sm:$0xff]  ;;  %s2122_s16 = smov %s1395_s26 }
  0x3a   : >> { %159 = vst [vmem:[%s1188_s21 + $0xa0] sm:$0xff] %v158_v10 }
  0x3b   : >> { %161 = vst [vmem:[%s1188_s21 + $0xb0] sm:$0xff] %v160_v11 }
  0x3c   : >> { %163 = vst [vmem:[%s1188_s21 + $0x88] sm:$0xff] %v162_v12 }
  0x3d   : >> { %165 = vst [vmem:[%s1188_s21 + $0x98] sm:$0xff] %v164_v13 }
  0x3e   : >> { %167 = vst [vmem:[%s1188_s21 + $0xa8] sm:$0xff] %v166_v14 }
  0x3f   : >> { %169 = vst [vmem:[%s1188_s21 + $0xb8] sm:$0xff] %v168_v15 }
  0x40   : >> { %171 = vst [vmem:[%s1188_s21 + $0x100] sm:$0xff] %v170_v16 }
  0x41   : >> { %173 = vst [vmem:[%s1188_s21 + $0x110] sm:$0xff] %v172_v17 }
  0x42   : >> { %175 = vst [vmem:[%s1188_s21 + $0x120] sm:$0xff] %v174_v18 }
  0x43   : >> { %177 = vst [vmem:[%s1188_s21 + $0x130] sm:$0xff] %v176_v19 }
  0x44   : >> { %179 = vst [vmem:[%s1188_s21 + $0x108] sm:$0xff] %v178_v20 }
  0x45   : >> { %181 = vst [vmem:[%s1188_s21 + $0x118] sm:$0xff] %v180_v21 }
  0x46   : >> { %183 = vst [vmem:[%s1188_s21 + $0x128] sm:$0xff] %v182_v22 }
  0x47   : >> { %185 = vst [vmem:[%s1188_s21 + $0x138] sm:$0xff] %v184_v23 }
  0x48   : >> { %187 = vst [vmem:[%s1188_s21 + $0x180] sm:$0xff] %v186_v24 }
  0x49   : >> { %189 = vst [vmem:[%s1188_s21 + $0x190] sm:$0xff] %v188_v25 }
  0x4a   : >> { %191 = vst [vmem:[%s1188_s21 + $0x1a0] sm:$0xff] %v190_v26 }
  0x4b   : >> { %193 = vst [vmem:[%s1188_s21 + $0x1b0] sm:$0xff] %v192_v27  ;;  %134 = sbr.rel (!%p131_p5) target bundleno = 47 (0x2f), region = 109 }
  0x4c   : >> { %195 = vst [vmem:[%s1188_s21 + $0x188] sm:$0xff] %v194_v28 }
  0x4d   : >> { %197 = vst [vmem:[%s1188_s21 + $0x198] sm:$0xff] %v196_v29 }
  0x4e   : >> { %199 = vst [vmem:[%s1188_s21 + $0x1a8] sm:$0xff] %v198_v30 }
  0x4f   : >> { %201 = vst [vmem:[%s1188_s21 + $0x1b8] sm:$0xff] %v200_v31  ;;  %s2121_s21 = smov %s1398_s27 }
  0x50   : > { %819 = sbr.rel (%p880_p6) target bundleno = 96 (0x60), region = 114  ;;  %s2124_s17 = smov (!%p880_p6), %s1470_s0 }
  0x51   : > { %s2125_s23 = smov (!%p880_p6), %s1467_s24  ;;  %s1479_s21 = smov (!%p880_p6), 0  }
  0x52   : > { %s1481_s16 = smov (!%p880_p6), 0  }
  0x55 LB: >> { %v225_v32 = vld [vmem:[%s1208_s23] sm:$0xff]  ;;  %v227_v33 = vld [vmem:[%s1208_s23 + $0x8] sm:$0xff]  ;;  %v229_v34 = vld [vmem:[%s1208_s23 + $0xd0] sm:$0xff]  ;;  %s241_s19 = sadd.s32 1, %s1212_s21  ;;  %s219_s16 = sadd.s32 1, %s1216_s16   ;;  %s1216_s16 = sphi %s1481_s16, %s219_s16   ;;  %s1212_s21 = sphi %s1479_s21, %s2127_s21   ;;  %s1208_s23 = sphi %s2125_s23, %s246_s23   ;;  %s1204_s17 = sphi %s2124_s17, %s2126_s17  }
  0x56   : >> { %226 = vst [vmem:[%s1204_s17] sm:$0xff] %v225_v32  ;;  %v231_v35 = vld [vmem:[%s1208_s23 + $0xd8] sm:$0xff]  ;;  %p242_p7 = scmp.ge.s32.totalorder %s241_s19, %s1463_s28  ;;  %v233_v36 = vld [vmem:[%s1208_s23 + $0x1a0] sm:$0xff]  ;;  %v235_v37 = vld [vmem:[%s1208_s23 + $0x1a8] sm:$0xff]  ;;  %p218_p8 = scmp.ge.s32.totalorder %s219_s16, %s1463_s28 }
  0x57   : >> { %228 = vst [vmem:[%s1204_s17 + $0x8] sm:$0xff] %v227_v33  ;;  %v237_v38 = vld [vmem:[%s1208_s23 + $0x270] sm:$0xff]  ;;  %v239_v39 = vld [vmem:[%s1208_s23 + $0x278] sm:$0xff] }
  0x58   : >> { %230 = vst [vmem:[%s1204_s17 + $0x80] sm:$0xff] %v229_v34  ;;  %s2149_s19 = smov (%p242_p7, %s241_s19), 0 }
  0x59   : >> { %232 = vst [vmem:[%s1204_s17 + $0x88] sm:$0xff] %v231_v35  ;;  %s881_s20 = sshll.u32 %s2149_s19, 4  ;;  %s2127_s21 = smov %s2149_s19 }
  0x5a   : >> { %234 = vst [vmem:[%s1204_s17 + $0x100] sm:$0xff] %v233_v36  ;;  %s246_s23 = scalar_lea.vmem %s1467_s24, %s881_s20   ;;  %s247_s29 = scalar_lea.vmem %s1470_s0, %s881_s20 [#allocation2]  }
  0x5b   : >> { %236 = vst [vmem:[%s1204_s17 + $0x108] sm:$0xff] %v235_v37  ;;  %221 = sbr.rel (!%p218_p8) target bundleno = 85 (0x55), region = 120 }
  0x5c   : >> { %238 = vst [vmem:[%s1204_s17 + $0x180] sm:$0xff] %v237_v38 }
  0x5d   : >> { %240 = vst [vmem:[%s1204_s17 + $0x188] sm:$0xff] %v239_v39  ;;  %s2126_s17 = smov %s247_s29 }
  0x60 PF: > { %p883_p9 = scmp.ge.s32.totalorder %s1184_s15, 1  ;;  %p252_p10 = scmp.lt.s32.totalorder %s1184_s15, 5 }
  0x62   : > { %p253_p11 = pnand %p883_p9, %p252_p10 }
  0x63   : > { %s259_s5 = sand.u32 (!%p253_p11), 1, %s1160_s9   ;;  %s275_s22 = sand.u32 (!%p253_p11), 1, %s1152_s7  }
  0x64   : > { %256 = sbr.rel (%p253_p11) target bundleno = 298 (0x12a), region = 50  ;;  %s884_s26 = sshll.u32 (!%p253_p11), %s259_s5, 9 }
  0x65   : > { %s885_s27 = sshll.u32 (!%p253_p11), %s275_s22, 9  ;;  %s886_s0 = sshll.u32 (!%p253_p11), %s1168_s11, 6 }
  0x66   : > { %s1508_s28 = sadd.s32 (!%p253_p11), 64, %s886_s0  ;;  %s1510_s25 = scalar_lea.vmem (!%p253_p11), [#allocation2], %s884_s26 }
  0x67   : > { %s1512_s24 = scalar_lea.vmem (!%p253_p11), [#allocation3], %s885_s27  ;;  %p887_p12 = scmp.gt.s32.totalorder (!%p253_p11), %s1508_s28, 100 }
  0x69   : > { %294 = sbr.rel (%p887_p12) target bundleno = 175 (0xaf), region = 58 }
  0x6e   : > { %v295_v40 = vld [vmem:[%s1510_s25] sm:$0xff]  ;;  %v296_v41 = vld [vmem:[%s1510_s25 + $0x8] sm:$0xff]  ;;  %vm360_vm0 = vcmask 588800   ;;  %v297_v42 = vld [vmem:[%s1510_s25 + $0x10] sm:$0xff] }
  0x6f   : > { %359 = vst [vmem:[%s1512_s24] sm:$0xff] %v295_v40  ;;  %v298_v43 = vld [vmem:[%s1510_s25 + $0x18] sm:$0xff]  ;;  %v299_v44 = vld [vmem:[%s1510_s25 + $0x20] sm:$0xff]  ;;  %v300_v45 = vld [vmem:[%s1510_s25 + $0x28] sm:$0xff] }
  0x70   : > { %361 = vst.msk [vmem:[%s1512_s24 + $0x8] sm:$0xff] %vm360_vm0, %v296_v41  ;;  %v301_v46 = vld [vmem:[%s1510_s25 + $0x30] sm:$0xff]  ;;  %v302_v47 = vld [vmem:[%s1510_s25 + $0x38] sm:$0xff]  ;;  %v303_v48 = vld [vmem:[%s1510_s25 + $0x40] sm:$0xff] }
  0x71   : > { %362 = vst [vmem:[%s1512_s24 + $0x10] sm:$0xff] %v297_v42  ;;  %v304_v49 = vld [vmem:[%s1510_s25 + $0x48] sm:$0xff]  ;;  %v305_v50 = vld [vmem:[%s1510_s25 + $0x50] sm:$0xff]  ;;  %v306_v51 = vld [vmem:[%s1510_s25 + $0x58] sm:$0xff] }
  0x72   : > { %363 = vst.msk [vmem:[%s1512_s24 + $0x18] sm:$0xff] %vm360_vm0, %v298_v43  ;;  %v307_v52 = vld [vmem:[%s1510_s25 + $0x60] sm:$0xff]  ;;  %v308_v53 = vld [vmem:[%s1510_s25 + $0x68] sm:$0xff]  ;;  %v309_v54 = vld [vmem:[%s1510_s25 + $0x70] sm:$0xff] }
  0x73   : > { %364 = vst [vmem:[%s1512_s24 + $0x20] sm:$0xff] %v299_v44  ;;  %v310_v55 = vld [vmem:[%s1510_s25 + $0x78] sm:$0xff]  ;;  %v311_v56 = vld [vmem:[%s1510_s25 + $0x80] sm:$0xff]  ;;  %v312_v57 = vld [vmem:[%s1510_s25 + $0x88] sm:$0xff] }
  0x74   : > { %365 = vst.msk [vmem:[%s1512_s24 + $0x28] sm:$0xff] %vm360_vm0, %v300_v45  ;;  %v313_v58 = vld [vmem:[%s1510_s25 + $0x90] sm:$0xff]  ;;  %v314_v59 = vld [vmem:[%s1510_s25 + $0x98] sm:$0xff]  ;;  %v315_v60 = vld [vmem:[%s1510_s25 + $0xa0] sm:$0xff] }
  0x75   : > { %366 = vst [vmem:[%s1512_s24 + $0x30] sm:$0xff] %v301_v46  ;;  %v316_v61 = vld [vmem:[%s1510_s25 + $0xa8] sm:$0xff]  ;;  %v317_v62 = vld [vmem:[%s1510_s25 + $0xb0] sm:$0xff]  ;;  %v318_v63 = vld [vmem:[%s1510_s25 + $0xb8] sm:$0xff] }
  0x76   : > { %367 = vst.msk [vmem:[%s1512_s24 + $0x38] sm:$0xff] %vm360_vm0, %v302_v47  ;;  %v319_v0 = vld [vmem:[%s1510_s25 + $0xc0] sm:$0xff]  ;;  %v320_v1 = vld [vmem:[%s1510_s25 + $0xc8] sm:$0xff]  ;;  %v321_v2 = vld [vmem:[%s1510_s25 + $0xd0] sm:$0xff] }
  0x77   : > { %368 = vst [vmem:[%s1512_s24 + $0x40] sm:$0xff] %v303_v48  ;;  %v322_v3 = vld [vmem:[%s1510_s25 + $0xd8] sm:$0xff]  ;;  %v323_v4 = vld [vmem:[%s1510_s25 + $0xe0] sm:$0xff]  ;;  %v324_v5 = vld [vmem:[%s1510_s25 + $0xe8] sm:$0xff] }
  0x78   : > { %369 = vst.msk [vmem:[%s1512_s24 + $0x48] sm:$0xff] %vm360_vm0, %v304_v49  ;;  %v325_v6 = vld [vmem:[%s1510_s25 + $0xf0] sm:$0xff]  ;;  %v326_v7 = vld [vmem:[%s1510_s25 + $0xf8] sm:$0xff]  ;;  %v327_v8 = vld [vmem:[%s1510_s25 + $0x100] sm:$0xff] }
  0x79   : > { %370 = vst [vmem:[%s1512_s24 + $0x50] sm:$0xff] %v305_v50  ;;  %v328_v9 = vld [vmem:[%s1510_s25 + $0x108] sm:$0xff]  ;;  %v329_v10 = vld [vmem:[%s1510_s25 + $0x110] sm:$0xff]  ;;  %v330_v11 = vld [vmem:[%s1510_s25 + $0x118] sm:$0xff] }
  0x7a   : > { %371 = vst.msk [vmem:[%s1512_s24 + $0x58] sm:$0xff] %vm360_vm0, %v306_v51  ;;  %v331_v12 = vld [vmem:[%s1510_s25 + $0x120] sm:$0xff]  ;;  %v332_v13 = vld [vmem:[%s1510_s25 + $0x128] sm:$0xff]  ;;  %v333_v14 = vld [vmem:[%s1510_s25 + $0x130] sm:$0xff] }
  0x7b   : > { %372 = vst [vmem:[%s1512_s24 + $0x60] sm:$0xff] %v307_v52  ;;  %v334_v15 = vld [vmem:[%s1510_s25 + $0x138] sm:$0xff]  ;;  %v335_v16 = vld [vmem:[%s1510_s25 + $0x140] sm:$0xff]  ;;  %v336_v17 = vld [vmem:[%s1510_s25 + $0x148] sm:$0xff] }
  0x7c   : > { %373 = vst.msk [vmem:[%s1512_s24 + $0x68] sm:$0xff] %vm360_vm0, %v308_v53  ;;  %v337_v18 = vld [vmem:[%s1510_s25 + $0x150] sm:$0xff]  ;;  %v338_v19 = vld [vmem:[%s1510_s25 + $0x158] sm:$0xff]  ;;  %v339_v20 = vld [vmem:[%s1510_s25 + $0x160] sm:$0xff] }
  0x7d   : > { %374 = vst [vmem:[%s1512_s24 + $0x70] sm:$0xff] %v309_v54  ;;  %v340_v21 = vld [vmem:[%s1510_s25 + $0x168] sm:$0xff]  ;;  %v341_v22 = vld [vmem:[%s1510_s25 + $0x170] sm:$0xff]  ;;  %v342_v23 = vld [vmem:[%s1510_s25 + $0x178] sm:$0xff] }
  0x7e   : > { %375 = vst.msk [vmem:[%s1512_s24 + $0x78] sm:$0xff] %vm360_vm0, %v310_v55  ;;  %v343_v24 = vld [vmem:[%s1510_s25 + $0x180] sm:$0xff]  ;;  %v344_v25 = vld [vmem:[%s1510_s25 + $0x188] sm:$0xff]  ;;  %v345_v26 = vld [vmem:[%s1510_s25 + $0x190] sm:$0xff] }
  0x7f   : > { %376 = vst [vmem:[%s1512_s24 + $0x80] sm:$0xff] %v311_v56  ;;  %v346_v27 = vld [vmem:[%s1510_s25 + $0x198] sm:$0xff]  ;;  %v347_v28 = vld [vmem:[%s1510_s25 + $0x1a0] sm:$0xff]  ;;  %v348_v29 = vld [vmem:[%s1510_s25 + $0x1a8] sm:$0xff] }
  0x80   : > { %377 = vst.msk [vmem:[%s1512_s24 + $0x88] sm:$0xff] %vm360_vm0, %v312_v57  ;;  %v349_v30 = vld [vmem:[%s1510_s25 + $0x1b0] sm:$0xff]  ;;  %v350_v31 = vld [vmem:[%s1510_s25 + $0x1b8] sm:$0xff]  ;;  %v351_v32 = vld [vmem:[%s1510_s25 + $0x1c0] sm:$0xff] }
  0x81   : > { %378 = vst [vmem:[%s1512_s24 + $0x90] sm:$0xff] %v313_v58  ;;  %v352_v33 = vld [vmem:[%s1510_s25 + $0x1c8] sm:$0xff]  ;;  %v353_v34 = vld [vmem:[%s1510_s25 + $0x1d0] sm:$0xff]  ;;  %v354_v35 = vld [vmem:[%s1510_s25 + $0x1d8] sm:$0xff] }
  0x82   : > { %379 = vst.msk [vmem:[%s1512_s24 + $0x98] sm:$0xff] %vm360_vm0, %v314_v59  ;;  %v355_v36 = vld [vmem:[%s1510_s25 + $0x1e0] sm:$0xff]  ;;  %v356_v37 = vld [vmem:[%s1510_s25 + $0x1e8] sm:$0xff]  ;;  %v357_v38 = vld [vmem:[%s1510_s25 + $0x1f0] sm:$0xff] }
  0x83   : > { %380 = vst [vmem:[%s1512_s24 + $0xa0] sm:$0xff] %v315_v60  ;;  %v358_v39 = vld [vmem:[%s1510_s25 + $0x1f8] sm:$0xff] }
  0x84   : > { %381 = vst.msk [vmem:[%s1512_s24 + $0xa8] sm:$0xff] %vm360_vm0, %v316_v61 }
  0x85   : > { %382 = vst [vmem:[%s1512_s24 + $0xb0] sm:$0xff] %v317_v62 }
  0x86   : > { %383 = vst.msk [vmem:[%s1512_s24 + $0xb8] sm:$0xff] %vm360_vm0, %v318_v63 }
  0x87   : > { %384 = vst [vmem:[%s1512_s24 + $0xc0] sm:$0xff] %v319_v0 }
  0x88   : > { %385 = vst.msk [vmem:[%s1512_s24 + $0xc8] sm:$0xff] %vm360_vm0, %v320_v1 }
  0x89   : > { %386 = vst [vmem:[%s1512_s24 + $0xd0] sm:$0xff] %v321_v2 }
  0x8a   : > { %387 = vst.msk [vmem:[%s1512_s24 + $0xd8] sm:$0xff] %vm360_vm0, %v322_v3 }
  0x8b   : > { %388 = vst [vmem:[%s1512_s24 + $0xe0] sm:$0xff] %v323_v4 }
  0x8c   : > { %389 = vst.msk [vmem:[%s1512_s24 + $0xe8] sm:$0xff] %vm360_vm0, %v324_v5 }
  0x8d   : > { %390 = vst [vmem:[%s1512_s24 + $0xf0] sm:$0xff] %v325_v6 }
  0x8e   : > { %391 = vst.msk [vmem:[%s1512_s24 + $0xf8] sm:$0xff] %vm360_vm0, %v326_v7 }
  0x8f   : > { %392 = vst [vmem:[%s1512_s24 + $0x100] sm:$0xff] %v327_v8 }
  0x90   : > { %393 = vst.msk [vmem:[%s1512_s24 + $0x108] sm:$0xff] %vm360_vm0, %v328_v9 }
  0x91   : > { %394 = vst [vmem:[%s1512_s24 + $0x110] sm:$0xff] %v329_v10 }
  0x92   : > { %395 = vst.msk [vmem:[%s1512_s24 + $0x118] sm:$0xff] %vm360_vm0, %v330_v11 }
  0x93   : > { %396 = vst [vmem:[%s1512_s24 + $0x120] sm:$0xff] %v331_v12 }
  0x94   : > { %397 = vst.msk [vmem:[%s1512_s24 + $0x128] sm:$0xff] %vm360_vm0, %v332_v13 }
  0x95   : > { %398 = vst [vmem:[%s1512_s24 + $0x130] sm:$0xff] %v333_v14 }
  0x96   : > { %399 = vst.msk [vmem:[%s1512_s24 + $0x138] sm:$0xff] %vm360_vm0, %v334_v15 }
  0x97   : > { %400 = vst [vmem:[%s1512_s24 + $0x140] sm:$0xff] %v335_v16 }
  0x98   : > { %401 = vst.msk [vmem:[%s1512_s24 + $0x148] sm:$0xff] %vm360_vm0, %v336_v17 }
  0x99   : > { %402 = vst [vmem:[%s1512_s24 + $0x150] sm:$0xff] %v337_v18 }
  0x9a   : > { %403 = vst.msk [vmem:[%s1512_s24 + $0x158] sm:$0xff] %vm360_vm0, %v338_v19 }
  0x9b   : > { %404 = vst [vmem:[%s1512_s24 + $0x160] sm:$0xff] %v339_v20 }
  0x9c   : > { %405 = vst.msk [vmem:[%s1512_s24 + $0x168] sm:$0xff] %vm360_vm0, %v340_v21 }
  0x9d   : > { %406 = vst [vmem:[%s1512_s24 + $0x170] sm:$0xff] %v341_v22 }
  0x9e   : > { %407 = vst.msk [vmem:[%s1512_s24 + $0x178] sm:$0xff] %vm360_vm0, %v342_v23 }
  0x9f   : > { %408 = vst [vmem:[%s1512_s24 + $0x180] sm:$0xff] %v343_v24 }
  0xa0   : > { %409 = vst.msk [vmem:[%s1512_s24 + $0x188] sm:$0xff] %vm360_vm0, %v344_v25 }
  0xa1   : > { %410 = vst [vmem:[%s1512_s24 + $0x190] sm:$0xff] %v345_v26 }
  0xa2   : > { %411 = vst.msk [vmem:[%s1512_s24 + $0x198] sm:$0xff] %vm360_vm0, %v346_v27 }
  0xa3   : > { %412 = vst [vmem:[%s1512_s24 + $0x1a0] sm:$0xff] %v347_v28 }
  0xa4   : > { %413 = vst.msk [vmem:[%s1512_s24 + $0x1a8] sm:$0xff] %vm360_vm0, %v348_v29 }
  0xa5   : > { %414 = vst [vmem:[%s1512_s24 + $0x1b0] sm:$0xff] %v349_v30 }
  0xa6   : > { %415 = vst.msk [vmem:[%s1512_s24 + $0x1b8] sm:$0xff] %vm360_vm0, %v350_v31 }
  0xa7   : > { %416 = vst [vmem:[%s1512_s24 + $0x1c0] sm:$0xff] %v351_v32 }
  0xa8   : > { %417 = vst.msk [vmem:[%s1512_s24 + $0x1c8] sm:$0xff] %vm360_vm0, %v352_v33 }
  0xa9   : > { %418 = vst [vmem:[%s1512_s24 + $0x1d0] sm:$0xff] %v353_v34 }
  0xaa   : > { %419 = vst.msk [vmem:[%s1512_s24 + $0x1d8] sm:$0xff] %vm360_vm0, %v354_v35 }
  0xab   : > { %420 = vst [vmem:[%s1512_s24 + $0x1e0] sm:$0xff] %v355_v36 }
  0xac   : > { %421 = vst.msk [vmem:[%s1512_s24 + $0x1e8] sm:$0xff] %vm360_vm0, %v356_v37 }
  0xad   : > { %422 = vst [vmem:[%s1512_s24 + $0x1f0] sm:$0xff] %v357_v38 }
  0xae   : > { %423 = vst.msk [vmem:[%s1512_s24 + $0x1f8] sm:$0xff] %vm360_vm0, %v358_v39 }
  0xaf PF: > { %p888_p1 = scmp.le.s32.totalorder %s1508_s28, 100 }
  0xb1   : > { %427 = sbr.rel (%p888_p1) target bundleno = 254 (0xfe), region = 62 }
  0xb6   : > { %v428_v40 = vlaneseq  ;;  %v437_v41 = vstv %s886_s0  ;;  %v454_v44 = vld [vmem:[%s1510_s25] sm:$0xff]  ;;  %v455_v45 = vld [vmem:[%s1510_s25 + $0x8] sm:$0xff]  ;;  %vm599_vm1 = vcmask 588800   ;;  %v456_v53 = vld [vmem:[%s1510_s25 + $0x10] sm:$0xff] }
  0xb7   : > { %v457_v54 = vld [vmem:[%s1510_s25 + $0x18] sm:$0xff]  ;;  %v458_v56 = vld [vmem:[%s1510_s25 + $0x20] sm:$0xff]  ;;  %v459_v60 = vld [vmem:[%s1510_s25 + $0x28] sm:$0xff] }
  0xb8   : > { %v429_v42 = vshrl.u32 %v428_v40, 7  ;;  %v460_v63 = vld [vmem:[%s1510_s25 + $0x30] sm:$0xff]  ;;  %v461_v4 = vld [vmem:[%s1510_s25 + $0x38] sm:$0xff]  ;;  %v462_v6 = vld [vmem:[%s1510_s25 + $0x40] sm:$0xff] }
  0xb9   : > { %v463_v9 = vld [vmem:[%s1510_s25 + $0x48] sm:$0xff]  ;;  %v464_v11 = vld [vmem:[%s1510_s25 + $0x50] sm:$0xff]  ;;  %v465_v14 = vld [vmem:[%s1510_s25 + $0x58] sm:$0xff] }
  0xba   : > { %v1678_v43 = vadd.s32 %v437_v41, %v429_v42  ;;  %v430_v46 = vadd.s32 8, %v429_v42  ;;  %v431_v47 = vadd.s32 16, %v429_v42  ;;  %v432_v48 = vadd.s32 24, %v429_v42  ;;  %v466_v16 = vld [vmem:[%s1510_s25 + $0x60] sm:$0xff]  ;;  %v467_v18 = vld [vmem:[%s1510_s25 + $0x68] sm:$0xff]  ;;  %v468_v20 = vld [vmem:[%s1510_s25 + $0x70] sm:$0xff] }
  0xbb   : > { %v433_v49 = vadd.s32 32, %v429_v42  ;;  %v434_v50 = vadd.s32 40, %v429_v42  ;;  %v435_v51 = vadd.s32 48, %v429_v42  ;;  %v436_v62 = vadd.s32 56, %v429_v42  ;;  %v469_v22 = vld [vmem:[%s1510_s25 + $0x78] sm:$0xff]  ;;  %v470_v24 = vld [vmem:[%s1510_s25 + $0x80] sm:$0xff] }
  0xbc   : > { %vm446_vm2 = vcmp.lt.s32.totalorder %v1678_v43, 100  ;;  %v1683_v52 = vadd.s32 %v437_v41, %v430_v46  ;;  %v1687_v55 = vadd.s32 %v437_v41, %v431_v47  ;;  %v1690_v57 = vadd.s32 %v437_v41, %v432_v48  ;;  %v471_v26 = vld [vmem:[%s1510_s25 + $0x88] sm:$0xff]  ;;  %v472_v28 = vld [vmem:[%s1510_s25 + $0x90] sm:$0xff]  ;;  %v473_v30 = vld [vmem:[%s1510_s25 + $0x98] sm:$0xff] }
  0xbd   : > { %v534_v58 = vsel %vm446_vm2, %v454_v44, 0.0  ;;  %v535_v59 = vsel %vm446_vm2, %v455_v45, 0.0  ;;  %v1697_v61 = vadd.s32 %v437_v41, %v433_v49  ;;  %v1704_v0 = vadd.s32 %v437_v41, %v434_v50  ;;  %v474_v32 = vld [vmem:[%s1510_s25 + $0xa0] sm:$0xff]  ;;  %v475_v34 = vld [vmem:[%s1510_s25 + $0xa8] sm:$0xff]  ;;  %v476_v36 = vld [vmem:[%s1510_s25 + $0xb0] sm:$0xff] }
  0xbe   : > { %598 = vst [vmem:[%s1512_s24] sm:$0xff] %v534_v58  ;;  %vm447_vm3 = vcmp.lt.s32.totalorder %v1683_v52, 100  ;;  %vm448_vm4 = vcmp.lt.s32.totalorder %v1687_v55, 100  ;;  %vm449_vm5 = vcmp.lt.s32.totalorder %v1690_v57, 100  ;;  %v1720_v7 = vadd.s32 %v437_v41, %v435_v51  ;;  %v477_v38 = vld [vmem:[%s1510_s25 + $0xb8] sm:$0xff]  ;;  %v478_v40 = vld [vmem:[%s1510_s25 + $0xc0] sm:$0xff]  ;;  %v479_v42 = vld [vmem:[%s1510_s25 + $0xc8] sm:$0xff] }
  0xbf   : > { %600 = vst.msk [vmem:[%s1512_s24 + $0x8] sm:$0xff] %vm599_vm1, %v535_v59  ;;  %v536_v1 = vsel %vm447_vm3, %v456_v53, 0.0  ;;  %v537_v2 = vsel %vm447_vm3, %v457_v54, 0.0  ;;  %v538_v3 = vsel %vm448_vm4, %v458_v56, 0.0  ;;  %v539_v5 = vsel %vm448_vm4, %v459_v60, 0.0  ;;  %v480_v45 = vld [vmem:[%s1510_s25 + $0xd0] sm:$0xff] }
  0xc0   : > { %601 = vst [vmem:[%s1512_s24 + $0x10] sm:$0xff] %v536_v1  ;;  %vm450_vm6 = vcmp.lt.s32.totalorder %v1697_v61, 100  ;;  %v540_v8 = vsel %vm449_vm5, %v460_v63, 0.0  ;;  %v541_v10 = vsel %vm449_vm5, %v461_v4, 0.0  ;;  %vm451_vm7 = vcmp.lt.s32.totalorder %v1704_v0, 100  ;;  %v481_v47 = vld [vmem:[%s1510_s25 + $0xd8] sm:$0xff] }
  0xc1   : > { %602 = vst.msk [vmem:[%s1512_s24 + $0x18] sm:$0xff] %vm599_vm1, %v537_v2  ;;  %v1732_v12 = vadd.s32 %v437_v41, %v436_v62  ;;  %v542_v13 = vsel %vm450_vm6, %v462_v6, 0.0  ;;  %v543_v15 = vsel %vm450_vm6, %v463_v9, 0.0  ;;  %vm452_vm8 = vcmp.lt.s32.totalorder %v1720_v7, 100  ;;  %v482_v49 = vld [vmem:[%s1510_s25 + $0xe0] sm:$0xff]  ;;  %v483_v51 = vld [vmem:[%s1510_s25 + $0xe8] sm:$0xff] }
  0xc2   : > { %603 = vst [vmem:[%s1512_s24 + $0x20] sm:$0xff] %v538_v3  ;;  %v544_v17 = vsel %vm451_vm7, %v464_v11, 0.0  ;;  %v545_v19 = vsel %vm451_vm7, %v465_v14, 0.0  ;;  %v546_v21 = vsel %vm452_vm8, %v466_v16, 0.0  ;;  %v547_v23 = vsel %vm452_vm8, %v467_v18, 0.0  ;;  %v484_v54 = vld [vmem:[%s1510_s25 + $0xf0] sm:$0xff] }
  0xc3   : > { %604 = vst.msk [vmem:[%s1512_s24 + $0x28] sm:$0xff] %vm599_vm1, %v539_v5  ;;  %vm453_vm9 = vcmp.lt.s32.totalorder %v1732_v12, 100  ;;  %v550_v29 = vsel %vm446_vm2, %v470_v24, 0.0  ;;  %v551_v31 = vsel %vm446_vm2, %v471_v26, 0.0  ;;  %v552_v33 = vsel %vm447_vm3, %v472_v28, 0.0  ;;  %v485_v58 = vld [vmem:[%s1510_s25 + $0xf8] sm:$0xff] }
  0xc4   : > { %605 = vst [vmem:[%s1512_s24 + $0x30] sm:$0xff] %v540_v8  ;;  %v548_v25 = vsel %vm453_vm9, %v468_v20, 0.0  ;;  %v549_v27 = vsel %vm453_vm9, %v469_v22, 0.0  ;;  %v553_v35 = vsel %vm447_vm3, %v473_v30, 0.0  ;;  %v554_v37 = vsel %vm448_vm4, %v474_v32, 0.0  ;;  %v486_v60 = vld [vmem:[%s1510_s25 + $0x100] sm:$0xff] }
  0xc5   : > { %606 = vst.msk [vmem:[%s1512_s24 + $0x38] sm:$0xff] %vm599_vm1, %v541_v10  ;;  %v555_v39 = vsel %vm448_vm4, %v475_v34, 0.0  ;;  %v556_v41 = vsel %vm449_vm5, %v476_v36, 0.0  ;;  %v557_v44 = vsel %vm449_vm5, %v477_v38, 0.0  ;;  %v558_v46 = vsel %vm450_vm6, %v478_v40, 0.0  ;;  %v487_v63 = vld [vmem:[%s1510_s25 + $0x108] sm:$0xff] }
  0xc6   : > { %607 = vst [vmem:[%s1512_s24 + $0x40] sm:$0xff] %v542_v13  ;;  %v559_v48 = vsel %vm450_vm6, %v479_v42, 0.0  ;;  %v560_v50 = vsel %vm451_vm7, %v480_v45, 0.0  ;;  %v561_v53 = vsel %vm451_vm7, %v481_v47, 0.0  ;;  %v562_v56 = vsel %vm452_vm8, %v482_v49, 0.0  ;;  %v488_v2 = vld [vmem:[%s1510_s25 + $0x110] sm:$0xff] }
  0xc7   : > { %608 = vst.msk [vmem:[%s1512_s24 + $0x48] sm:$0xff] %vm599_vm1, %v543_v15  ;;  %v563_v59 = vsel %vm452_vm8, %v483_v51, 0.0  ;;  %v564_v62 = vsel %vm453_vm9, %v484_v54, 0.0  ;;  %v565_v1 = vsel %vm453_vm9, %v485_v58, 0.0  ;;  %v566_v3 = vsel %vm446_vm2, %v486_v60, 0.0  ;;  %v489_v4 = vld [vmem:[%s1510_s25 + $0x118] sm:$0xff] }
  0xc8   : > { %609 = vst [vmem:[%s1512_s24 + $0x50] sm:$0xff] %v544_v17  ;;  %v567_v5 = vsel %vm446_vm2, %v487_v63, 0.0  ;;  %v490_v6 = vld [vmem:[%s1510_s25 + $0x120] sm:$0xff]  ;;  %v568_v8 = vsel %vm447_vm3, %v488_v2, 0.0  ;;  %v491_v9 = vld [vmem:[%s1510_s25 + $0x128] sm:$0xff]  ;;  %v569_v10 = vsel %vm447_vm3, %v489_v4, 0.0 }
  0xc9   : > { %610 = vst.msk [vmem:[%s1512_s24 + $0x58] sm:$0xff] %vm599_vm1, %v545_v19  ;;  %v492_v11 = vld [vmem:[%s1510_s25 + $0x130] sm:$0xff]  ;;  %v570_v13 = vsel %vm448_vm4, %v490_v6, 0.0  ;;  %v493_v14 = vld [vmem:[%s1510_s25 + $0x138] sm:$0xff]  ;;  %v571_v15 = vsel %vm448_vm4, %v491_v9, 0.0  ;;  %v494_v16 = vld [vmem:[%s1510_s25 + $0x140] sm:$0xff] }
  0xca   : > { %611 = vst [vmem:[%s1512_s24 + $0x60] sm:$0xff] %v546_v21  ;;  %v572_v17 = vsel %vm449_vm5, %v492_v11, 0.0  ;;  %v495_v18 = vld [vmem:[%s1510_s25 + $0x148] sm:$0xff]  ;;  %v573_v19 = vsel %vm449_vm5, %v493_v14, 0.0  ;;  %v496_v20 = vld [vmem:[%s1510_s25 + $0x150] sm:$0xff]  ;;  %v574_v21 = vsel %vm450_vm6, %v494_v16, 0.0 }
  0xcb   : > { %612 = vst.msk [vmem:[%s1512_s24 + $0x68] sm:$0xff] %vm599_vm1, %v547_v23  ;;  %v497_v22 = vld [vmem:[%s1510_s25 + $0x158] sm:$0xff]  ;;  %v575_v23 = vsel %vm450_vm6, %v495_v18, 0.0  ;;  %v498_v24 = vld [vmem:[%s1510_s25 + $0x160] sm:$0xff]  ;;  %v499_v26 = vld [vmem:[%s1510_s25 + $0x168] sm:$0xff] }
  0xcc   : > { %613 = vst [vmem:[%s1512_s24 + $0x70] sm:$0xff] %v548_v25  ;;  %v576_v25 = vsel %vm451_vm7, %v496_v20, 0.0  ;;  %v500_v28 = vld [vmem:[%s1510_s25 + $0x170] sm:$0xff]  ;;  %v501_v30 = vld [vmem:[%s1510_s25 + $0x178] sm:$0xff]  ;;  %v502_v32 = vld [vmem:[%s1510_s25 + $0x180] sm:$0xff] }
  0xcd   : > { %614 = vst.msk [vmem:[%s1512_s24 + $0x78] sm:$0xff] %vm599_vm1, %v549_v27  ;;  %v577_v27 = vsel %vm451_vm7, %v497_v22, 0.0  ;;  %v503_v34 = vld [vmem:[%s1510_s25 + $0x188] sm:$0xff]  ;;  %v504_v36 = vld [vmem:[%s1510_s25 + $0x190] sm:$0xff]  ;;  %v505_v38 = vld [vmem:[%s1510_s25 + $0x198] sm:$0xff] }
  0xce   : > { %615 = vst [vmem:[%s1512_s24 + $0x80] sm:$0xff] %v550_v29  ;;  %v578_v29 = vsel %vm452_vm8, %v498_v24, 0.0  ;;  %v506_v40 = vld [vmem:[%s1510_s25 + $0x1a0] sm:$0xff]  ;;  %v507_v42 = vld [vmem:[%s1510_s25 + $0x1a8] sm:$0xff]  ;;  %v508_v45 = vld [vmem:[%s1510_s25 + $0x1b0] sm:$0xff] }
  0xcf   : > { %616 = vst.msk [vmem:[%s1512_s24 + $0x88] sm:$0xff] %vm599_vm1, %v551_v31  ;;  %v579_v31 = vsel %vm452_vm8, %v499_v26, 0.0  ;;  %v586_v43 = vsel %vm448_vm4, %v506_v40, 0.0  ;;  %v587_v47 = vsel %vm448_vm4, %v507_v42, 0.0  ;;  %v588_v52 = vsel %vm449_vm5, %v508_v45, 0.0  ;;  %v511_v49 = vld [vmem:[%s1510_s25 + $0x1c8] sm:$0xff] }
  0xd0   : > { %617 = vst [vmem:[%s1512_s24 + $0x90] sm:$0xff] %v552_v33  ;;  %v580_v33 = vsel %vm453_vm9, %v500_v28, 0.0  ;;  %v512_v51 = vld [vmem:[%s1510_s25 + $0x1d0] sm:$0xff]  ;;  %v591_v54 = vsel %vm450_vm6, %v511_v49, 0.0  ;;  %v515_v58 = vld [vmem:[%s1510_s25 + $0x1e8] sm:$0xff] }
  0xd1   : > { %618 = vst.msk [vmem:[%s1512_s24 + $0x98] sm:$0xff] %vm599_vm1, %v553_v35  ;;  %v581_v35 = vsel %vm453_vm9, %v501_v30, 0.0  ;;  %v592_v57 = vsel %vm451_vm7, %v512_v51, 0.0  ;;  %v516_v60 = vld [vmem:[%s1510_s25 + $0x1f0] sm:$0xff]  ;;  %v595_v63 = vsel %vm452_vm8, %v515_v58, 0.0 }
  0xd2   : > { %619 = vst [vmem:[%s1512_s24 + $0xa0] sm:$0xff] %v554_v37  ;;  %v582_v37 = vsel %vm446_vm2, %v502_v32, 0.0 }
  0xd3   : > { %620 = vst.msk [vmem:[%s1512_s24 + $0xa8] sm:$0xff] %vm599_vm1, %v555_v39  ;;  %v583_v39 = vsel %vm446_vm2, %v503_v34, 0.0 }
  0xd4   : > { %621 = vst [vmem:[%s1512_s24 + $0xb0] sm:$0xff] %v556_v41  ;;  %v584_v41 = vsel %vm447_vm3, %v504_v36, 0.0 }
  0xd5   : > { %622 = vst.msk [vmem:[%s1512_s24 + $0xb8] sm:$0xff] %vm599_vm1, %v557_v44  ;;  %v585_v44 = vsel %vm447_vm3, %v505_v38, 0.0 }
  0xd6   : > { %623 = vst [vmem:[%s1512_s24 + $0xc0] sm:$0xff] %v558_v46  ;;  %v509_v46 = vld [vmem:[%s1510_s25 + $0x1b8] sm:$0xff] }
  0xd7   : > { %624 = vst.msk [vmem:[%s1512_s24 + $0xc8] sm:$0xff] %vm599_vm1, %v559_v48  ;;  %v510_v48 = vld [vmem:[%s1510_s25 + $0x1c0] sm:$0xff] }
  0xd8   : > { %625 = vst [vmem:[%s1512_s24 + $0xd0] sm:$0xff] %v560_v50  ;;  %v589_v50 = vsel %vm449_vm5, %v509_v46, 0.0  ;;  %v590_v55 = vsel %vm450_vm6, %v510_v48, 0.0 }
  0xd9   : > { %626 = vst.msk [vmem:[%s1512_s24 + $0xd8] sm:$0xff] %vm599_vm1, %v561_v53  ;;  %v513_v53 = vld [vmem:[%s1510_s25 + $0x1d8] sm:$0xff] }
  0xda   : > { %627 = vst [vmem:[%s1512_s24 + $0xe0] sm:$0xff] %v562_v56  ;;  %v514_v56 = vld [vmem:[%s1510_s25 + $0x1e0] sm:$0xff] }
  0xdb   : > { %628 = vst.msk [vmem:[%s1512_s24 + $0xe8] sm:$0xff] %vm599_vm1, %v563_v59  ;;  %v593_v59 = vsel %vm451_vm7, %v513_v53, 0.0  ;;  %v594_v61 = vsel %vm452_vm8, %v514_v56, 0.0 }
  0xdc   : > { %629 = vst [vmem:[%s1512_s24 + $0xf0] sm:$0xff] %v564_v62  ;;  %v517_v62 = vld [vmem:[%s1510_s25 + $0x1f8] sm:$0xff] }
  0xdd   : > { %630 = vst.msk [vmem:[%s1512_s24 + $0xf8] sm:$0xff] %vm599_vm1, %v565_v1  ;;  %v596_v1 = vsel %vm453_vm9, %v516_v60, 0.0  ;;  %v597_v0 = vsel %vm453_vm9, %v517_v62, 0.0 }
  0xde   : > { %631 = vst [vmem:[%s1512_s24 + $0x100] sm:$0xff] %v566_v3 }
  0xdf   : > { %632 = vst.msk [vmem:[%s1512_s24 + $0x108] sm:$0xff] %vm599_vm1, %v567_v5 }
  0xe0   : > { %633 = vst [vmem:[%s1512_s24 + $0x110] sm:$0xff] %v568_v8 }
  0xe1   : > { %634 = vst.msk [vmem:[%s1512_s24 + $0x118] sm:$0xff] %vm599_vm1, %v569_v10 }
  0xe2   : > { %635 = vst [vmem:[%s1512_s24 + $0x120] sm:$0xff] %v570_v13 }
  0xe3   : > { %636 = vst.msk [vmem:[%s1512_s24 + $0x128] sm:$0xff] %vm599_vm1, %v571_v15 }
  0xe4   : > { %637 = vst [vmem:[%s1512_s24 + $0x130] sm:$0xff] %v572_v17 }
  0xe5   : > { %638 = vst.msk [vmem:[%s1512_s24 + $0x138] sm:$0xff] %vm599_vm1, %v573_v19 }
  0xe6   : > { %639 = vst [vmem:[%s1512_s24 + $0x140] sm:$0xff] %v574_v21 }
  0xe7   : > { %640 = vst.msk [vmem:[%s1512_s24 + $0x148] sm:$0xff] %vm599_vm1, %v575_v23 }
  0xe8   : > { %641 = vst [vmem:[%s1512_s24 + $0x150] sm:$0xff] %v576_v25 }
  0xe9   : > { %642 = vst.msk [vmem:[%s1512_s24 + $0x158] sm:$0xff] %vm599_vm1, %v577_v27 }
  0xea   : > { %643 = vst [vmem:[%s1512_s24 + $0x160] sm:$0xff] %v578_v29 }
  0xeb   : > { %644 = vst.msk [vmem:[%s1512_s24 + $0x168] sm:$0xff] %vm599_vm1, %v579_v31 }
  0xec   : > { %645 = vst [vmem:[%s1512_s24 + $0x170] sm:$0xff] %v580_v33 }
  0xed   : > { %646 = vst.msk [vmem:[%s1512_s24 + $0x178] sm:$0xff] %vm599_vm1, %v581_v35 }
  0xee   : > { %647 = vst [vmem:[%s1512_s24 + $0x180] sm:$0xff] %v582_v37 }
  0xef   : > { %648 = vst.msk [vmem:[%s1512_s24 + $0x188] sm:$0xff] %vm599_vm1, %v583_v39 }
  0xf0   : > { %649 = vst [vmem:[%s1512_s24 + $0x190] sm:$0xff] %v584_v41 }
  0xf1   : > { %650 = vst.msk [vmem:[%s1512_s24 + $0x198] sm:$0xff] %vm599_vm1, %v585_v44 }
  0xf2   : > { %651 = vst [vmem:[%s1512_s24 + $0x1a0] sm:$0xff] %v586_v43 }
  0xf3   : > { %652 = vst.msk [vmem:[%s1512_s24 + $0x1a8] sm:$0xff] %vm599_vm1, %v587_v47 }
  0xf4   : > { %653 = vst [vmem:[%s1512_s24 + $0x1b0] sm:$0xff] %v588_v52 }
  0xf5   : > { %654 = vst.msk [vmem:[%s1512_s24 + $0x1b8] sm:$0xff] %vm599_vm1, %v589_v50 }
  0xf6   : > { %655 = vst [vmem:[%s1512_s24 + $0x1c0] sm:$0xff] %v590_v55 }
  0xf7   : > { %656 = vst.msk [vmem:[%s1512_s24 + $0x1c8] sm:$0xff] %vm599_vm1, %v591_v54 }
  0xf8   : > { %657 = vst [vmem:[%s1512_s24 + $0x1d0] sm:$0xff] %v592_v57 }
  0xf9   : > { %658 = vst.msk [vmem:[%s1512_s24 + $0x1d8] sm:$0xff] %vm599_vm1, %v593_v59 }
  0xfa   : > { %659 = vst [vmem:[%s1512_s24 + $0x1e0] sm:$0xff] %v594_v61 }
  0xfb   : > { %660 = vst.msk [vmem:[%s1512_s24 + $0x1e8] sm:$0xff] %vm599_vm1, %v595_v63 }
  0xfc   : > { %661 = vst [vmem:[%s1512_s24 + $0x1f0] sm:$0xff] %v596_v1 }
  0xfd   : > { %662 = vst.msk [vmem:[%s1512_s24 + $0x1f8] sm:$0xff] %vm599_vm1, %v597_v0 }
  0xfe PF: > { %vm663_vm10 = vcmask 1048128   ;;  %v1218_v7 = vmov 0.0   ;;  %s697_s9 = scalar_lea.sflag [#allocation4], %s275_s22 }
  0xff   : > { %664 = vst.msk [vmem:[%s1512_s24 + $0x8] sm:$0xff] %vm663_vm10, %v1218_v7 }
 0x100   : > { %665 = vst.msk [vmem:[%s1512_s24 + $0x18] sm:$0xff] %vm663_vm10, %v1218_v7 }
 0x101   : > { %666 = vst.msk [vmem:[%s1512_s24 + $0x28] sm:$0xff] %vm663_vm10, %v1218_v7 }
 0x102   : > { %667 = vst.msk [vmem:[%s1512_s24 + $0x38] sm:$0xff] %vm663_vm10, %v1218_v7 }
 0x103   : > { %668 = vst.msk [vmem:[%s1512_s24 + $0x48] sm:$0xff] %vm663_vm10, %v1218_v7 }
 0x104   : > { %669 = vst.msk [vmem:[%s1512_s24 + $0x58] sm:$0xff] %vm663_vm10, %v1218_v7 }
 0x105   : > { %670 = vst.msk [vmem:[%s1512_s24 + $0x68] sm:$0xff] %vm663_vm10, %v1218_v7 }
 0x106   : > { %671 = vst.msk [vmem:[%s1512_s24 + $0x78] sm:$0xff] %vm663_vm10, %v1218_v7 }
 0x107   : > { %672 = vst.msk [vmem:[%s1512_s24 + $0x88] sm:$0xff] %vm663_vm10, %v1218_v7 }
 0x108   : > { %673 = vst.msk [vmem:[%s1512_s24 + $0x98] sm:$0xff] %vm663_vm10, %v1218_v7 }
 0x109   : > { %674 = vst.msk [vmem:[%s1512_s24 + $0xa8] sm:$0xff] %vm663_vm10, %v1218_v7 }
 0x10a   : > { %675 = vst.msk [vmem:[%s1512_s24 + $0xb8] sm:$0xff] %vm663_vm10, %v1218_v7 }
 0x10b   : > { %676 = vst.msk [vmem:[%s1512_s24 + $0xc8] sm:$0xff] %vm663_vm10, %v1218_v7 }
 0x10c   : > { %677 = vst.msk [vmem:[%s1512_s24 + $0xd8] sm:$0xff] %vm663_vm10, %v1218_v7 }
 0x10d   : > { %678 = vst.msk [vmem:[%s1512_s24 + $0xe8] sm:$0xff] %vm663_vm10, %v1218_v7 }
 0x10e   : > { %679 = vst.msk [vmem:[%s1512_s24 + $0xf8] sm:$0xff] %vm663_vm10, %v1218_v7 }
 0x10f   : > { %680 = vst.msk [vmem:[%s1512_s24 + $0x108] sm:$0xff] %vm663_vm10, %v1218_v7 }
 0x110   : > { %681 = vst.msk [vmem:[%s1512_s24 + $0x118] sm:$0xff] %vm663_vm10, %v1218_v7 }
 0x111   : > { %682 = vst.msk [vmem:[%s1512_s24 + $0x128] sm:$0xff] %vm663_vm10, %v1218_v7 }
 0x112   : > { %683 = vst.msk [vmem:[%s1512_s24 + $0x138] sm:$0xff] %vm663_vm10, %v1218_v7 }
 0x113   : > { %684 = vst.msk [vmem:[%s1512_s24 + $0x148] sm:$0xff] %vm663_vm10, %v1218_v7 }
 0x114   : > { %685 = vst.msk [vmem:[%s1512_s24 + $0x158] sm:$0xff] %vm663_vm10, %v1218_v7 }
 0x115   : > { %686 = vst.msk [vmem:[%s1512_s24 + $0x168] sm:$0xff] %vm663_vm10, %v1218_v7 }
 0x116   : > { %687 = vst.msk [vmem:[%s1512_s24 + $0x178] sm:$0xff] %vm663_vm10, %v1218_v7 }
 0x117   : > { %688 = vst.msk [vmem:[%s1512_s24 + $0x188] sm:$0xff] %vm663_vm10, %v1218_v7 }
 0x118   : > { %689 = vst.msk [vmem:[%s1512_s24 + $0x198] sm:$0xff] %vm663_vm10, %v1218_v7 }
 0x119   : > { %690 = vst.msk [vmem:[%s1512_s24 + $0x1a8] sm:$0xff] %vm663_vm10, %v1218_v7 }
 0x11a   : > { %691 = vst.msk [vmem:[%s1512_s24 + $0x1b8] sm:$0xff] %vm663_vm10, %v1218_v7 }
 0x11b   : > { %692 = vst.msk [vmem:[%s1512_s24 + $0x1c8] sm:$0xff] %vm663_vm10, %v1218_v7 }
 0x11c   : > { %693 = vst.msk [vmem:[%s1512_s24 + $0x1d8] sm:$0xff] %vm663_vm10, %v1218_v7 }
 0x11d   : > { %694 = vst.msk [vmem:[%s1512_s24 + $0x1e8] sm:$0xff] %vm663_vm10, %v1218_v7 }
 0x11e   : > { %695 = vst.msk [vmem:[%s1512_s24 + $0x1f8] sm:$0xff] %vm663_vm10, %v1218_v7 }
 0x11f   : > { %s901_s17 = sshll.u32 %s1168_s11, 4  ;;  %s902_s23 = sshll.u32 %s1172_s12, 7 }
 0x120   : > { %s710_s21 = sadd.s32 %s902_s23, %s901_s17  ;;  %s723_s16 = sshll.u32 %s1512_s24, 4  ;;  %s724_s16 = int_to_ptr.vmem [resolvable:$true] %s723_s16 }
 0x121   : > { %s894_s19 = sshll.u32 %s710_s21, 3  ;;  %s1219_s26 = smov 2048  }
 0x122   : > { %s712_s5 = scalar_lea.hbm %s2111_s1, %s894_s19  ;;  %904 = sst [smem:[#allocation6]] (%p1327_p13), %s1219_s26 }
 0x123   : > { %s725_s22 = sshll.u32 %s712_s5, 4  ;;  %s1220_s27 = smov 4096   ;;  %s726_s22 = int_to_ptr.hbm [resolvable:$true] %s725_s22 }
 0x124   : > { %905 = sst [smem:[#allocation6 + $0x1]] (%p1327_p13), %s1220_s27  ;;  %s1221_s11 = smov 8  }
 0x125   : > { %906 = sst [smem:[#allocation6 + $0x2]] (%p1327_p13), %s1221_s11  ;;  %s1222_s12 = smov 256  }
 0x126   : > { %907 = sst [smem:[#allocation6 + $0x3]] (%p1327_p13), %s1222_s12  ;;  %s1223_s0 = smov 16  }
 0x127   : > { %908 = sst [smem:[#allocation6 + $0x4]] (%p1327_p13), %s1222_s12  ;;  %s1224_s28 = smov [#allocation5]  }
 0x128   : > { %909 = sst [smem:[#allocation6 + $0x5]] (%p1327_p13), %s1223_s0  ;;  %s1225_s25 = smov 0  }
 0x129   : > { %910 = dma.general (%p1327_p13), %s724_s16, 8192, %s726_s22, %s697_s9, %s1224_s28, [#allocation6], %s1225_s25, 0  }
 0x12a PF: > { %p916_p2 = scmp.ge.s32.totalorder %s1184_s15, 2  ;;  %s753_s24 = sand.u32 1, %s1148_s6  }
 0x12b   : > { %s754_s17 = scalar_lea.sflag [#allocation4], %s753_s24 }
 0x12c   : > { %p913_p3 = pnand %p916_p2, %p1331_p0 }
 0x12e   : > { %p914_p4 = pneg %p913_p3 }
 0x130   : > { %1143 = dma.done.wait (%p914_p4), %s754_s17, 8192  }
 0x131   : > { %1145 = vsyncadd (%p914_p4), %s754_s17, 4294959104  ;;  %s14_s15 = sadd.s32 1, %s1184_s15   ;;  %s2128_s3 = sld [smem:[#allocation8_spill]] }
 0x132   : > { %p11_p5 = scmp.ge.s32.totalorder %s14_s15, 6   ;;  %s2129_s6 = smov %s1152_s7 }
 0x133   : > { %s2130_s7 = smov %s1156_s8  ;;  %s2131_s8 = smov %s1316_s30 }
 0x134   : > { %s2132_s9 = smov %s1164_s10  ;;  %s2133_s10 = smov %s1319_s2 }
 0x135   : > { %s2134_s11 = smov %s1176_s13  ;;  %s2135_s12 = smov %s1180_s14 }
 0x136   : > { %s2136_s13 = smov %s2139_s18  ;;  %13 = sbr.rel (!%p11_p5) target bundleno = 8 (0x8), region = 131 }
 0x137   : > { %s2137_s14 = smov %s2128_s3 }
 0x13b   :  { %760 = vsyncpa [#allocation4], 1 }
 0x13c   :  { %762 = vsyncpa [#allocation4 + $0x1], 1 }

</bundles_post_ra>
